<compile_context>
chip_gen: v5e
topology: v5e:2x2
jax: 0.10.0
libtpu: 0.0.40
codegen_flags: <defaults>
</compile_context>

<pallas_src>
import jax
import jax.numpy as jnp
from jax.experimental import pallas as pl
from jax.experimental.pallas import tpu as pltpu

PAD = 128  # lane-dense frame for all padded feature dims


def _round_up(n, m):
    return ((n + m - 1) // m) * m


def a2c_fused_kernel(x_ref, w_ref, b_ref, out_ref):
    """3 fused layers.  w_ref: (3, PAD, PAD), b_ref: (3, 1, PAD) f32.

    Layer 0: input                    (F  -> H)    then tanh
    Layer 1: [actor | critic] hidden  (H  -> 2H)   then tanh
    Layer 2: block-diag heads         (2H -> O+1)  cols [0:O]=logits, [O]=value
    """
    cdt = w_ref.dtype  # MXU operand dtype (f32 or bf16); accumulation is f32

    x = x_ref[...]  # (TB, PAD), already in cdt

    # h0 = tanh(x @ W_in + b_in)      -- f32 accumulate, f32 bias/tanh (VPU/EUP)
    h0 = jnp.tanh(
        jnp.dot(x, w_ref[0], preferred_element_type=jnp.float32) + b_ref[0]
    )

    # h1 = tanh(h0 @ [W_ah | W_ch] + [b_ah | b_ch])  -> (TB, 2H)
    h1 = jnp.tanh(
        jnp.dot(h0.astype(cdt), w_ref[1], preferred_element_type=jnp.float32)
        + b_ref[1]
    )

    # heads: block-diag [[W_a, 0], [0, W_c]] -> (TB, O+1), lane-dense store
    out_ref[...] = (
        jnp.dot(h1.astype(cdt), w_ref[2], preferred_element_type=jnp.float32)
        + b_ref[2]
    ).astype(out_ref.dtype)


def pack_params(params, dtype=jnp.float32):
    """Pack the 10 per-layer tensors into (3, PAD, PAD) weights + (3, 1, PAD)
    biases.  Zero padding / block-diagonal placement keeps the fused kernel
    numerically identical to the per-layer reference.  Biases stay f32."""
    F, H = params["w_in"].shape
    outputs = params["w_a"].shape[1]
    assert F <= PAD and 2 * H <= PAD and outputs + 1 <= PAD

    w_all = jnp.zeros((3, PAD, PAD), jnp.float32)
    b_all = jnp.zeros((3, 1, PAD), jnp.float32)

    # Layer 0: input (F -> H)
    w_all = w_all.at[0, :F, :H].set(params["w_in"])
    b_all = b_all.at[0, 0, :H].set(params["b_in"][0])

    # Layer 1: fused hidden [actor_hidden | critic_hidden] (H -> 2H)
    w_all = w_all.at[1, :H, :H].set(params["w_ah"])
    w_all = w_all.at[1, :H, H:2 * H].set(params["w_ch"])
    b_all = b_all.at[1, 0, :H].set(params["b_ah"][0])
    b_all = b_all.at[1, 0, H:2 * H].set(params["b_ch"][0])

    # Layer 2: block-diagonal heads (2H -> outputs + 1)
    w_all = w_all.at[2, :H, :outputs].set(params["w_a"])
    w_all = w_all.at[2, H:2 * H, outputs:outputs + 1].set(params["w_c"])
    b_all = b_all.at[2, 0, :outputs].set(params["b_a"][0])
    b_all = b_all.at[2, 0, outputs:outputs + 1].set(params["b_c"][0])

    return w_all.astype(dtype), b_all


def a2c_forward(x, params, *, param_dtype=jnp.float32, max_batch_tile=512):
    """x: (B, F) float32.  Returns (logits (B, O) f32, value (B, 1) f32)."""
    B, F = x.shape
    outputs = params["w_a"].shape[1]

    w_all, b_all = pack_params(params, dtype=param_dtype)

    # Batch tiling: TB multiple of 8, capped so double-buffered (TB, 128)
    # activation tiles + resident weights stay far inside v7x's 64 MiB VMEM.
    TB = min(_round_up(B, 8), max_batch_tile)
    B_pad = _round_up(B, TB)

    # Lane-dense padded input block (zero padding contributes nothing).
    x_pad = (
        jnp.zeros((B_pad, PAD), param_dtype)
        .at[:B, :F]
        .set(x.astype(param_dtype))
    )

    out = pl.pallas_call(
        a2c_fused_kernel,
        out_shape=jax.ShapeDtypeStruct((B_pad, PAD), jnp.float32),
        grid=(B_pad // TB,),
        in_specs=[
            pl.BlockSpec((TB, PAD), lambda i: (i, 0)),            # x tile
            pl.BlockSpec((3, PAD, PAD), lambda i: (0, 0, 0)),     # all weights
            pl.BlockSpec((3, 1, PAD), lambda i: (0, 0, 0)),       # all biases
        ],
        out_specs=pl.BlockSpec((TB, PAD), lambda i: (i, 0)),      # fused output
        compiler_params=pltpu.CompilerParams(
            dimension_semantics=("parallel",),  # shard batch across TCs (v7x)
            vmem_limit_bytes=64 << 20,
        ),
    )(x_pad, w_all, b_all)

    logits = out[:B, :outputs]
    value = out[:B, outputs:outputs + 1]
    return logits, value


def init_params(key, input_features, hidden_neurons, outputs):
    """PyTorch-like uniform(-1/sqrt(fan_in), 1/sqrt(fan_in)) init.
    Weights in (in, out) layout; biases as (1, out)."""
    def linear(k, fan_in, fan_out):
        kw, kb = jax.random.split(k)
        bound = 1.0 / jnp.sqrt(fan_in)
        w = jax.random.uniform(kw, (fan_in, fan_out), jnp.float32, -bound, bound)
        b = jax.random.uniform(kb, (1, fan_out), jnp.float32, -bound, bound)
        return w, b

    k1, k2, k3, k4, k5 = jax.random.split(key, 5)
    w_in, b_in = linear(k1, input_features, hidden_neurons)
    w_ah, b_ah = linear(k2, hidden_neurons, hidden_neurons)
    w_a, b_a = linear(k3, hidden_neurons, outputs)
    w_ch, b_ch = linear(k4, hidden_neurons, hidden_neurons)
    w_c, b_c = linear(k5, hidden_neurons, 1)
    return dict(w_in=w_in, b_in=b_in, w_ah=w_ah, b_ah=b_ah,
                w_a=w_a, b_a=b_a, w_ch=w_ch, b_ch=b_ch,
                w_c=w_c, b_c=b_c)


def reference_forward(x, p):
    init = jnp.tanh(x @ p["w_in"] + p["b_in"])
    logits = jnp.tanh(init @ p["w_ah"] + p["b_ah"]) @ p["w_a"] + p["b_a"]
    value = jnp.tanh(init @ p["w_ch"] + p["b_ch"]) @ p["w_c"] + p["b_c"]
    return logits, value


if __name__ == "__main__":
    input_features = 16
    hidden_neurons = 32
    outputs = 8
    batch = 8

    key = jax.random.PRNGKey(0)
    k_params, k_x = jax.random.split(key)
    params = init_params(k_params, input_features, hidden_neurons, outputs)
    x = jax.random.normal(k_x, (batch, input_features), jnp.float32)

    ref_logits, ref_value = reference_forward(x, params)

    # --- f32 path: numerically matches the PyTorch-equivalent reference ---
    logits, value = a2c_forward(x, params, param_dtype=jnp.float32)
    jax.block_until_ready((logits, value))
    assert logits.shape == (batch, outputs)
    assert value.shape == (batch, 1)
    assert jnp.allclose(logits, ref_logits, atol=1e-5, rtol=1e-5)
    assert jnp.allclose(value, ref_value, atol=1e-5, rtol=1e-5)

    # --- multi-tile batch: exercises the grid pipeline and padded tail ---
    batch2 = 300  # non-multiple of the tile -> padded tail rows
    x2 = jax.random.normal(jax.random.PRNGKey(1), (batch2, input_features),
                           jnp.float32)
    ref_l2, ref_v2 = reference_forward(x2, params)
    l2, v2 = a2c_forward(x2, params, param_dtype=jnp.float32,
                         max_batch_tile=128)
    jax.block_until_ready((l2, v2))
    assert l2.shape == (batch2, outputs) and v2.shape == (batch2, 1)
    assert jnp.allclose(l2, ref_l2, atol=1e-5, rtol=1e-5)
    assert jnp.allclose(v2, ref_v2, atol=1e-5, rtol=1e-5)

    # --- bf16 weights/activations (f32 accumulate): v6e/v7x MXU-native ---
    logits_bf, value_bf = a2c_forward(x, params, param_dtype=jnp.bfloat16)
    jax.block_until_ready((logits_bf, value_bf))
    assert jnp.allclose(logits_bf, ref_logits, atol=5e-2, rtol=5e-2)
    assert jnp.allclose(value_bf, ref_value, atol=5e-2, rtol=5e-2)

    print("KERNEL_OK")
</pallas_src>

<mosaic_0001>
module attributes {stable_mosaic.version = 11 : i64} {
  func.func @a2c_fused_kernel(%arg0: i32, %arg1: memref<8x128xf32, #tpu.memory_space<vmem>>, %arg2: memref<3x128x128xf32, #tpu.memory_space<vmem>>, %arg3: memref<3x1x128xf32, #tpu.memory_space<vmem>>, %arg4: memref<8x128xf32, #tpu.memory_space<vmem>>) attributes {dimension_semantics = [#tpu.dimension_semantics<parallel>], iteration_bounds = array<i64: 1>, scalar_prefetch = 0 : i64, scratch_operands = 0 : i64, tpu.core_type = #tpu.core_type<tc>, window_params = [{transform_indices = @transform_0, window_bounds = array<i64: 8, 128>}, {pipeline_mode = #tpu.pipeline_mode<synchronous>, transform_indices = @transform_1, window_bounds = array<i64: 3, 128, 128>}, {pipeline_mode = #tpu.pipeline_mode<synchronous>, transform_indices = @transform_2, window_bounds = array<i64: 3, 1, 128>}, {transform_indices = @transform_3, window_bounds = array<i64: 8, 128>}]} {
    %c0 = arith.constant 0 : index
    %c0_0 = arith.constant 0 : index
    %0 = vector.load %arg1[%c0, %c0_0] : memref<8x128xf32, #tpu.memory_space<vmem>>, vector<8x128xf32>
    %c0_1 = arith.constant 0 : index
    %c0_2 = arith.constant 0 : index
    %c0_3 = arith.constant 0 : index
    %1 = vector.load %arg2[%c0_1, %c0_2, %c0_3] : memref<3x128x128xf32, #tpu.memory_space<vmem>>, vector<1x128x128xf32>
    %2 = vector.shape_cast %1 : vector<1x128x128xf32> to vector<128x128xf32>
    %cst = arith.constant dense<0.000000e+00> : vector<8x128xf32>
    %3 = tpu.matmul %0, %2, %cst {dimension_numbers = #tpu.dot_dimension_numbers<[1], [0], [0], [1], [0, 0, 1, 1], [], []>} : vector<8x128xf32>, vector<128x128xf32>, vector<8x128xf32> -> vector<8x128xf32>
    %c0_4 = arith.constant 0 : index
    %c0_5 = arith.constant 0 : index
    %c0_6 = arith.constant 0 : index
    %4 = vector.load %arg3[%c0_4, %c0_5, %c0_6] : memref<3x1x128xf32, #tpu.memory_space<vmem>>, vector<1x1x128xf32>
    %5 = vector.shape_cast %4 : vector<1x1x128xf32> to vector<1x128xf32>
    %6 = vector.broadcast %5 : vector<1x128xf32> to vector<8x128xf32>
    %7 = arith.addf %3, %6 : vector<8x128xf32>
    %8 = math.tanh %7 : vector<8x128xf32>
    %c1 = arith.constant 1 : index
    %c0_7 = arith.constant 0 : index
    %c0_8 = arith.constant 0 : index
    %9 = vector.load %arg2[%c1, %c0_7, %c0_8] : memref<3x128x128xf32, #tpu.memory_space<vmem>>, vector<1x128x128xf32>
    %10 = vector.shape_cast %9 : vector<1x128x128xf32> to vector<128x128xf32>
    %cst_9 = arith.constant dense<0.000000e+00> : vector<8x128xf32>
    %11 = tpu.matmul %8, %10, %cst_9 {dimension_numbers = #tpu.dot_dimension_numbers<[1], [0], [0], [1], [0, 0, 1, 1], [], []>} : vector<8x128xf32>, vector<128x128xf32>, vector<8x128xf32> -> vector<8x128xf32>
    %c1_10 = arith.constant 1 : index
    %c0_11 = arith.constant 0 : index
    %c0_12 = arith.constant 0 : index
    %12 = vector.load %arg3[%c1_10, %c0_11, %c0_12] : memref<3x1x128xf32, #tpu.memory_space<vmem>>, vector<1x1x128xf32>
    %13 = vector.shape_cast %12 : vector<1x1x128xf32> to vector<1x128xf32>
    %14 = vector.broadcast %13 : vector<1x128xf32> to vector<8x128xf32>
    %15 = arith.addf %11, %14 : vector<8x128xf32>
    %16 = math.tanh %15 : vector<8x128xf32>
    %c2 = arith.constant 2 : index
    %c0_13 = arith.constant 0 : index
    %c0_14 = arith.constant 0 : index
    %17 = vector.load %arg2[%c2, %c0_13, %c0_14] : memref<3x128x128xf32, #tpu.memory_space<vmem>>, vector<1x128x128xf32>
    %18 = vector.shape_cast %17 : vector<1x128x128xf32> to vector<128x128xf32>
    %cst_15 = arith.constant dense<0.000000e+00> : vector<8x128xf32>
    %19 = tpu.matmul %16, %18, %cst_15 {dimension_numbers = #tpu.dot_dimension_numbers<[1], [0], [0], [1], [0, 0, 1, 1], [], []>} : vector<8x128xf32>, vector<128x128xf32>, vector<8x128xf32> -> vector<8x128xf32>
    %c2_16 = arith.constant 2 : index
    %c0_17 = arith.constant 0 : index
    %c0_18 = arith.constant 0 : index
    %20 = vector.load %arg3[%c2_16, %c0_17, %c0_18] : memref<3x1x128xf32, #tpu.memory_space<vmem>>, vector<1x1x128xf32>
    %21 = vector.shape_cast %20 : vector<1x1x128xf32> to vector<1x128xf32>
    %22 = vector.broadcast %21 : vector<1x128xf32> to vector<8x128xf32>
    %23 = arith.addf %19, %22 : vector<8x128xf32>
    %c0_19 = arith.constant 0 : index
    %c0_20 = arith.constant 0 : index
    %24 = vector.load %arg4[%c0_19, %c0_20] : memref<8x128xf32, #tpu.memory_space<vmem>>, vector<8x128xf32>
    tpu.vector_store %arg4[%c0_19, %c0_20], %23 {strides = array<i32>} : memref<8x128xf32, #tpu.memory_space<vmem>>, vector<8x128xf32>,
    return
  }
  func.func @transform_0(%arg0: i32) -> (i32, i32) {
    %c0_i32 = arith.constant 0 : i32
    %c0_i32_0 = arith.constant 0 : i32
    return %arg0, %c0_i32 : i32, i32
  }
  func.func @transform_1(%arg0: i32) -> (i32, i32, i32) {
    %c0_i32 = arith.constant 0 : i32
    %c0_i32_0 = arith.constant 0 : i32
    %c0_i32_1 = arith.constant 0 : i32
    %c0_i32_2 = arith.constant 0 : i32
    return %c0_i32, %c0_i32_0, %c0_i32_1 : i32, i32, i32
  }
  func.func @transform_2(%arg0: i32) -> (i32, i32, i32) {
    %c0_i32 = arith.constant 0 : i32
    %c0_i32_0 = arith.constant 0 : i32
    %c0_i32_1 = arith.constant 0 : i32
    %c0_i32_2 = arith.constant 0 : i32
    return %c0_i32, %c0_i32_0, %c0_i32_1 : i32, i32, i32
  }
  func.func @transform_3(%arg0: i32) -> (i32, i32) {
    %c0_i32 = arith.constant 0 : i32
    %c0_i32_0 = arith.constant 0 : i32
    return %arg0, %c0_i32 : i32, i32
  }
}

</mosaic_0001>

<bundles_post_ra>
// kernel: tpu_custom_call.1
= control target key start
LH: loop header
LB: loop body
LE: loop exit
PB: predicated region body
PF: predicated region fallthrough
CT: control target
= control target key end

     0   :  { %8 = vsyncpa [#allocation3], 0  ;;  %s363_s0 = inlined_call_operand.hbm [shape: f32[8,128], index: 0, kind: input, shape index: {}]   ;;  %s364_s1 = inlined_call_operand.hbm [shape: f32[3,128,128], index: 1, kind: input, shape index: {}]   ;;  %s365_s2 = inlined_call_operand.hbm [shape: f32[3,1,128], index: 2, kind: input, shape index: {}]   ;;  %s366_s3 = inlined_call_operand.hbm [shape: f32[8,128], index: 3, kind: output, shape index: {}]  }
   0x1   :  { %9 = vsyncpa [#allocation6], 0  ;;  %s26_s14 = sshll.u32 %s364_s1, 4  ;;  %s27_s14 = int_to_ptr.hbm [resolvable:$true] %s26_s14 }
   0x2   :  { %10 = vsyncpa [#allocation4], 0  ;;  %s323_s15 = smov [#allocation5]   ;;  %s16_s19 = sshll.u32 %s363_s0, 4  ;;  %s17_s19 = int_to_ptr.hbm [resolvable:$true] %s16_s19 }
   0x3   :  { %s28_s16 = sshll.u32 %s323_s15, 4  ;;  %s324_s20 = smov 128   ;;  %s29_s16 = int_to_ptr.vmem [resolvable:$true] %s28_s16 }
   0x4   :  { %s325_s21 = smov 8   ;;  %s326_s22 = smov [#allocation2]  }
   0x5   :  { %34 = dma.hbm_to_vmem [thread:$0]  %s27_s14, 6144, %s29_s16, [#allocation6], %s324_s20, %s324_s20, %s325_s21  }
   0x6   :  { %s18_s23 = sshll.u32 %s326_s22, 4  ;;  %s39_s26 = sshll.u32 %s365_s2, 4  ;;  %s19_s23 = int_to_ptr.vmem [resolvable:$true] %s18_s23  ;;  %s40_s26 = int_to_ptr.hbm [resolvable:$true] %s39_s26 }
   0x7   :  { %21 = dma.hbm_to_vmem [thread:$0]  %s17_s19, 128, %s19_s23, [#allocation3]  }
   0x8   :  { %s327_s1 = smov [#allocation7]   ;;  %s328_s28 = smov 16  }
   0x9   :  { %s41_s27 = sshll.u32 %s327_s1, 4  ;;  %s329_s29 = smov 1   ;;  %s42_s27 = int_to_ptr.vmem [resolvable:$true] %s41_s27 }
   0xa   :  { %47 = dma.hbm_to_vmem [thread:$0]  %s40_s26, 48, %s42_s27, [#allocation6], %s328_s28, %s328_s28, %s329_s29  }
   0xb   :  { %317 = dma.done.wait [#allocation3], 128  }
   0xc   :  { %318 = vsyncadd [#allocation3], 4294967168 }
   0xd   :  { %319 = dma.done.wait [#allocation6], 6192  }
   0xe   :  { %320 = vsyncadd [#allocation6], 4294961104  ;;  %v76_v0 = vld [vmem:[#allocation5 + $0x78] sm:$0xff]  ;;  %v75_v1 = vld [vmem:[#allocation5 + $0x70] sm:$0xff]  ;;  %s330_s0 = smov [#allocation8]   ;;  %s195_s5 = sshll.u32 %s366_s3, 4  ;;  %s196_s5 = int_to_ptr.hbm [resolvable:$true] %s195_s5 }
   0xf   :  { %81 = vmatpush.msra.mxu0 %v76_v0  ;;  %v74_v2 = vld [vmem:[#allocation5 + $0x68] sm:$0xff]  ;;  %v73_v3 = vld [vmem:[#allocation5 + $0x60] sm:$0xff]  ;;  %v118_v4 = vld [vmem:[#allocation5 + $0xf8] sm:$0xff]  ;;  %s193_s2 = sshll.u32 %s330_s0, 4  ;;  %s194_s2 = int_to_ptr.vmem [resolvable:$true] %s193_s2 }
  0x10   :  { %v72_v5 = vld [vmem:[#allocation5 + $0x58] sm:$0xff]  ;;  %124 = vmatpush.msra.mxu1 %v118_v4  ;;  %v117_v6 = vld [vmem:[#allocation5 + $0xf0] sm:$0xff]  ;;  %v116_v7 = vld [vmem:[#allocation5 + $0xe8] sm:$0xff] }
  0x11   :  { %82 = vmatpush.msra.mxu0 %v75_v1  ;;  %v71_v8 = vld [vmem:[#allocation5 + $0x50] sm:$0xff]  ;;  %v115_v9 = vld [vmem:[#allocation5 + $0xe0] sm:$0xff]  ;;  %v70_v10 = vld [vmem:[#allocation5 + $0x48] sm:$0xff] }
  0x12   :  { %125 = vmatpush.msra.mxu1 %v117_v6  ;;  %v114_v11 = vld [vmem:[#allocation5 + $0xd8] sm:$0xff]  ;;  %v69_v12 = vld [vmem:[#allocation5 + $0x40] sm:$0xff]  ;;  %v113_v13 = vld [vmem:[#allocation5 + $0xd0] sm:$0xff] }
  0x13   :  { %83 = vmatpush.msra.mxu0 %v74_v2  ;;  %v68_v14 = vld [vmem:[#allocation5 + $0x38] sm:$0xff]  ;;  %v112_v15 = vld [vmem:[#allocation5 + $0xc8] sm:$0xff]  ;;  %v67_v16 = vld [vmem:[#allocation5 + $0x30] sm:$0xff] }
  0x14   :  { %126 = vmatpush.msra.mxu1 %v116_v7  ;;  %v111_v17 = vld [vmem:[#allocation5 + $0xc0] sm:$0xff]  ;;  %v66_v18 = vld [vmem:[#allocation5 + $0x28] sm:$0xff]  ;;  %v110_v19 = vld [vmem:[#allocation5 + $0xb8] sm:$0xff] }
  0x15   :  { %84 = vmatpush.msra.mxu0 %v73_v3  ;;  %v65_v20 = vld [vmem:[#allocation5 + $0x20] sm:$0xff]  ;;  %v109_v21 = vld [vmem:[#allocation5 + $0xb0] sm:$0xff]  ;;  %v64_v22 = vld [vmem:[#allocation5 + $0x18] sm:$0xff] }
  0x16   :  { %127 = vmatpush.msra.mxu1 %v115_v9  ;;  %v108_v23 = vld [vmem:[#allocation5 + $0xa8] sm:$0xff]  ;;  %v63_v24 = vld [vmem:[#allocation5 + $0x10] sm:$0xff]  ;;  %v61_v26 = vld [vmem:[#allocation5] sm:$0xff] }
  0x17   :  { %85 = vmatpush.msra.mxu0 %v72_v5  ;;  %v62_v25 = vld [vmem:[#allocation5 + $0x8] sm:$0xff]  ;;  %v60_v27 = vld [vmem:[#allocation2] sm:$0xff]  ;;  %v107_v28 = vld [vmem:[#allocation5 + $0xa0] sm:$0xff] }
  0x18   :  { %128 = vmatpush.msra.mxu1 %v114_v11  ;;  %v106_v29 = vld [vmem:[#allocation5 + $0x98] sm:$0xff]  ;;  %v105_v30 = vld [vmem:[#allocation5 + $0x90] sm:$0xff]  ;;  %v104_v31 = vld [vmem:[#allocation5 + $0x88] sm:$0xff] }
  0x19   :  { %86 = vmatpush.msra.mxu0 %v71_v8  ;;  %v103_v32 = vld [vmem:[#allocation5 + $0x80] sm:$0xff]  ;;  %v161_v33 = vld [vmem:[#allocation5 + $0x178] sm:$0xff]  ;;  %v160_v34 = vld [vmem:[#allocation5 + $0x170] sm:$0xff] }
  0x1a   :  { %129 = vmatpush.msra.mxu1 %v113_v13  ;;  %167 = vmatpush.msra.mxu2 %v161_v33  ;;  %v159_v35 = vld [vmem:[#allocation5 + $0x168] sm:$0xff]  ;;  %v158_v36 = vld [vmem:[#allocation5 + $0x160] sm:$0xff]  ;;  %v157_v37 = vld [vmem:[#allocation5 + $0x158] sm:$0xff] }
  0x1b   :  { %87 = vmatpush.msra.mxu0 %v70_v10  ;;  %v156_v38 = vld [vmem:[#allocation5 + $0x150] sm:$0xff]  ;;  %v155_v39 = vld [vmem:[#allocation5 + $0x148] sm:$0xff]  ;;  %v154_v40 = vld [vmem:[#allocation5 + $0x140] sm:$0xff] }
  0x1c   :  { %130 = vmatpush.msra.mxu1 %v112_v15  ;;  %168 = vmatpush.msra.mxu2 %v160_v34  ;;  %v153_v41 = vld [vmem:[#allocation5 + $0x138] sm:$0xff]  ;;  %v152_v42 = vld [vmem:[#allocation5 + $0x130] sm:$0xff]  ;;  %v151_v43 = vld [vmem:[#allocation5 + $0x128] sm:$0xff] }
  0x1d   :  { %88 = vmatpush.msra.mxu0 %v69_v12  ;;  %v214_v44 = vld [vmem:[#allocation7] ss:$0 sm:$0xff]  ;;  %v149_v49 = vld [vmem:[#allocation5 + $0x118] sm:$0xff]  ;;  %v148_v50 = vld [vmem:[#allocation5 + $0x110] sm:$0xff] }
  0x1e   :  { %131 = vmatpush.msra.mxu1 %v111_v17  ;;  %169 = vmatpush.msra.mxu2 %v159_v35  ;;  %v150_v48 = vld [vmem:[#allocation5 + $0x120] sm:$0xff]  ;;  %v147_v51 = vld [vmem:[#allocation5 + $0x108] sm:$0xff] }
  0x1f   :  { %89 = vmatpush.msra.mxu0 %v68_v14  ;;  %v146_v52 = vld [vmem:[#allocation5 + $0x100] sm:$0xff] }
  0x20   :  { %132 = vmatpush.msra.mxu1 %v110_v19  ;;  %170 = vmatpush.msra.mxu2 %v158_v36  ;;  %v215_v53 = vld [vmem:[#allocation7 + $0x1] ss:$0 sm:$0xff]  ;;  %v216_v57 = vld [vmem:[#allocation7 + $0x2] ss:$0 sm:$0xff] }
  0x21   :  { %90 = vmatpush.msra.mxu0 %v67_v16 }
  0x22   :  { %133 = vmatpush.msra.mxu1 %v109_v21  ;;  %171 = vmatpush.msra.mxu2 %v157_v37 }
  0x23   :  { %91 = vmatpush.msra.mxu0 %v66_v18 }
  0x24   :  { %134 = vmatpush.msra.mxu1 %v108_v23  ;;  %172 = vmatpush.msra.mxu2 %v156_v38 }
  0x25   :  { %92 = vmatpush.msra.mxu0 %v65_v20 }
  0x26   :  { %135 = vmatpush.msra.mxu1 %v107_v28  ;;  %173 = vmatpush.msra.mxu2 %v155_v39 }
  0x27   :  { %93 = vmatpush.msra.mxu0 %v64_v22 }
  0x28   :  { %136 = vmatpush.msra.mxu1 %v106_v29  ;;  %174 = vmatpush.msra.mxu2 %v154_v40 }
  0x29   :  { %94 = vmatpush.msra.mxu0 %v63_v24 }
  0x2a   :  { %137 = vmatpush.msra.mxu1 %v105_v30  ;;  %175 = vmatpush.msra.mxu2 %v153_v41 }
  0x2b   :  { %95 = vmatpush.msra.mxu0 %v62_v25 }
  0x2c   :  { %138 = vmatpush.msra.mxu1 %v104_v31  ;;  %176 = vmatpush.msra.mxu2 %v152_v42 }
  0x2d   :  { %96 = vmatpush.msra.mxu0 %v61_v26 }
  0x2e   :  { %97 = vmatmul.f32.vlgmr.msra.gmra.mxu0 %v60_v27  ;;  %139 = vmatpush.msra.mxu1 %v103_v32 }
  0x2f   :  { %177 = vmatpush.msra.mxu2 %v151_v43 }
  0x31   :  { %178 = vmatpush.msra.mxu2 %v150_v48 }
  0x33   :  { %179 = vmatpush.msra.mxu2 %v149_v49 }
  0x35   :  { %180 = vmatpush.msra.mxu2 %v148_v50 }
  0x37   :  { %181 = vmatpush.msra.mxu2 %v147_v51 }
  0x39   :  { %182 = vmatpush.msra.mxu2 %v146_v52 }
  0xab   :  { %v98_v45 = vpop.f32.mrf.mxu0 }
  0xac   :  { %v99_v46 = vadd.f32 %v214_v44, %v98_v45 }
  0xae   :  { %217 = vtanh.f32 %v99_v46 }
  0xb4   :  { %v218_v47 = vpop.eup %217 }
  0xb5   :  { %140 = vmatmul.f32.vlgmr.msra.gmra.mxu1 %v218_v47 }
 0x132   :  { %v141_v54 = vpop.f32.mrf.mxu1 }
 0x133   :  { %v142_v55 = vadd.f32 %v215_v53, %v141_v54 }
 0x135   :  { %219 = vtanh.f32 %v142_v55 }
 0x13b   :  { %v220_v56 = vpop.eup %219 }
 0x13c   :  { %183 = vmatmul.f32.vlgmr.msra.gmra.mxu2 %v220_v56 }
 0x1bf   :  { %v184_v58 = vpop.f32.mrf.mxu2 }
 0x1c0   :  { %v185_v59 = vadd.f32 %v216_v57, %v184_v58 }
 0x1c2   :  { %187 = vst [vmem:[#allocation8] sm:$0xff] %v185_v59 }
 0x1c3   :  { %198 = dma.vmem_to_hbm [thread:$0]  %s194_s2, 128, %s196_s5, [#allocation4]  }
 0x1c4   :  { %321 = dma.done.wait [#allocation4], 128  }
 0x1c5   :  { %322 = vsyncadd [#allocation4], 4294967168 }
 0x1c6   :  { %203 = vsyncpa [#allocation3], 1 }
 0x1c7   :  { %204 = vsyncpa [#allocation6], 1 }
 0x1c8   :  { %205 = vsyncpa [#allocation4], 1 }

</bundles_post_ra>
